<compile_context>
chip_gen: v5e
topology: v5e:2x2
jax: 0.10.0
libtpu: 0.0.40
codegen_flags: <defaults>
</compile_context>

<pallas_src>
import jax
import jax.numpy as jnp
from jax.experimental import pallas as pl
from jax.experimental.pallas import tpu as pltpu


def _round_up(x, m):
    return ((x + m - 1) // m) * m


def mask_generator_kernel(x_ref, w1_ref, w2_ref, b2_ref, out_ref):
    x = x_ref[...]                                               # (TB, Dp)

    # first linear (no bias) + ReLU, f32 accumulation on the MXU
    h = jnp.dot(x, w1_ref[...], preferred_element_type=jnp.float32)
    h = jnp.maximum(h, 0.0)                                      # (TB, Hp)

    # second linear + bias, then relu(tanh(.)) epilogue (fused, f32)
    m = jnp.dot(h.astype(w2_ref.dtype), w2_ref[...],
                preferred_element_type=jnp.float32)
    m = m + b2_ref[...].astype(jnp.float32)                      # (TB, Op)
    # relu(tanh(m)) == tanh(relu(m)) (tanh monotone, tanh(0)=0); either order
    # costs one EUP op + one VPU max.
    m = jnp.maximum(jnp.tanh(m), 0.0)

    out_ref[...] = m.astype(out_ref.dtype)


def mask_generator(x, w1, w2, b2, *, block_b=256):
    """x: (..., Din). w1: (hidden, Din), w2: (Dout, hidden) (PyTorch (out, in)
    convention); b2: (Dout,).  Returns (..., Dout)."""
    lead_shape = x.shape[:-1]
    Din = x.shape[-1]
    hidden = w1.shape[0]
    Dout = w2.shape[0]

    x2d = x.reshape(-1, Din)
    B = x2d.shape[0]

    # --- lane/sublane-dense padding of the feature axes ---------------------
    Dp = _round_up(Din, 8)        # sublane-align the resident W1^T panel
    Hp = _round_up(hidden, 128)   # lane-dense hidden (unmasked MXU groups)
    Op = _round_up(Dout, 128)     # lane-dense output (unmasked vst)

    w1_t = jnp.pad(w1.T, ((0, Dp - Din), (0, Hp - hidden)))       # (Dp, Hp)
    w2_t = jnp.pad(w2.T, ((0, Hp - hidden), (0, Op - Dout)))      # (Hp, Op)
    b2_p = jnp.pad(b2.reshape(1, Dout), ((0, 0), (0, Op - Dout)))  # (1, Op)

    # --- batch tiling --------------------------------------------------------
    TB = min(block_b, _round_up(B, 8))       # multiple of 8, capped at block_b
    Bp = _round_up(B, TB)
    x_p = jnp.pad(x2d, ((0, Bp - B), (0, Dp - Din)))
    grid = (Bp // TB,)

    out = pl.pallas_call(
        mask_generator_kernel,
        out_shape=jax.ShapeDtypeStruct((Bp, Op), x.dtype),
        grid=grid,
        in_specs=[
            pl.BlockSpec((TB, Dp), lambda i: (i, 0)),     # x tile, pipelined
            pl.BlockSpec((Dp, Hp), lambda i: (0, 0)),     # W1^T, resident
            pl.BlockSpec((Hp, Op), lambda i: (0, 0)),     # W2^T, resident
            pl.BlockSpec((1, Op), lambda i: (0, 0)),      # b2 row, resident
        ],
        out_specs=pl.BlockSpec((TB, Op), lambda i: (i, 0)),
        compiler_params=pltpu.CompilerParams(
            dimension_semantics=("parallel",)),
    )(x_p, w1_t, w2_t, b2_p)

    return out[:B, :Dout].reshape(*lead_shape, Dout)


def mask_generator_ref(x, w1, w2, b2):
    h = jnp.maximum(x @ w1.T, 0.0)
    return jnp.maximum(jnp.tanh(h @ w2.T + b2), 0.0)


if __name__ == "__main__":
    key = jax.random.PRNGKey(0)

    def init_w(k, out_f, in_f):
        bound = 1.0 / (in_f ** 0.5)
        return jax.random.uniform(k, (out_f, in_f), jnp.float32, -bound, bound)

    def init_b(k, out_f, in_f):
        bound = 1.0 / (in_f ** 0.5)
        return jax.random.uniform(k, (out_f,), jnp.float32, -bound, bound)

    # Case 1: small shapes (output_dim < 128 -> hidden = output_dim)
    B, input_dim, output_dim = 8, 32, 64
    hidden = output_dim if output_dim < 128 else output_dim // 2
    kx, k1, k2, k3 = jax.random.split(key, 4)
    x = jax.random.normal(kx, (B, input_dim), dtype=jnp.float32)
    w1 = init_w(k1, hidden, input_dim)          # mask_generator[0], bias=False
    w2 = init_w(k2, output_dim, hidden)         # mask_generator[2]
    b2 = init_b(k3, output_dim, hidden)

    out = jax.block_until_ready(mask_generator(x, w1, w2, b2))
    ref = mask_generator_ref(x, w1, w2, b2)
    assert out.shape == (B, output_dim)
    assert jnp.allclose(out, ref, atol=1e-5, rtol=1e-5), "case1 mismatch vs reference"

    # Case 2: non-multiple-of-8 batch and output_dim >= 128 -> hidden = Dout//2
    B2, input_dim2, output_dim2 = 10, 48, 256
    hidden2 = output_dim2 if output_dim2 < 128 else output_dim2 // 2
    kx2, k4, k5, k6 = jax.random.split(jax.random.PRNGKey(1), 4)
    x2 = jax.random.normal(kx2, (B2, input_dim2), dtype=jnp.float32)
    w1b = init_w(k4, hidden2, input_dim2)
    w2b = init_w(k5, output_dim2, hidden2)
    b2b = init_b(k6, output_dim2, hidden2)

    out2 = jax.block_until_ready(mask_generator(x2, w1b, w2b, b2b))
    ref2 = mask_generator_ref(x2, w1b, w2b, b2b)
    assert out2.shape == (B2, output_dim2)
    assert jnp.allclose(out2, ref2, atol=1e-5, rtol=1e-5), "case2 mismatch vs reference"

    print("KERNEL_OK")
</pallas_src>

<mosaic_0001>
module attributes {stable_mosaic.version = 11 : i64} {
  func.func @mask_generator_kernel(%arg0: i32, %arg1: memref<8x32xf32, #tpu.memory_space<vmem>>, %arg2: memref<32x128xf32, #tpu.memory_space<vmem>>, %arg3: memref<128x128xf32, #tpu.memory_space<vmem>>, %arg4: memref<1x128xf32, #tpu.memory_space<vmem>>, %arg5: memref<8x128xf32, #tpu.memory_space<vmem>>) attributes {dimension_semantics = [#tpu.dimension_semantics<parallel>], iteration_bounds = array<i64: 1>, scalar_prefetch = 0 : i64, scratch_operands = 0 : i64, tpu.core_type = #tpu.core_type<tc>, window_params = [{transform_indices = @transform_0, window_bounds = array<i64: 8, 32>}, {pipeline_mode = #tpu.pipeline_mode<synchronous>, transform_indices = @transform_1, window_bounds = array<i64: 32, 128>}, {pipeline_mode = #tpu.pipeline_mode<synchronous>, transform_indices = @transform_2, window_bounds = array<i64: 128, 128>}, {pipeline_mode = #tpu.pipeline_mode<synchronous>, transform_indices = @transform_3, window_bounds = array<i64: 1, 128>}, {transform_indices = @transform_4, window_bounds = array<i64: 8, 128>}]} {
    %c0 = arith.constant 0 : index
    %c0_0 = arith.constant 0 : index
    %0 = vector.load %arg1[%c0, %c0_0] : memref<8x32xf32, #tpu.memory_space<vmem>>, vector<8x32xf32>
    %c0_1 = arith.constant 0 : index
    %c0_2 = arith.constant 0 : index
    %1 = vector.load %arg2[%c0_1, %c0_2] : memref<32x128xf32, #tpu.memory_space<vmem>>, vector<32x128xf32>
    %cst = arith.constant dense<0.000000e+00> : vector<8x128xf32>
    %2 = tpu.matmul %0, %1, %cst {dimension_numbers = #tpu.dot_dimension_numbers<[1], [0], [0], [1], [0, 0, 1, 1], [], []>} : vector<8x32xf32>, vector<32x128xf32>, vector<8x128xf32> -> vector<8x128xf32>
    %cst_3 = arith.constant 0.000000e+00 : f32
    %3 = vector.broadcast %cst_3 : f32 to vector<8x128xf32>
    %4 = arith.maximumf %2, %3 : vector<8x128xf32>
    %c0_4 = arith.constant 0 : index
    %c0_5 = arith.constant 0 : index
    %5 = vector.load %arg3[%c0_4, %c0_5] : memref<128x128xf32, #tpu.memory_space<vmem>>, vector<128x128xf32>
    %cst_6 = arith.constant dense<0.000000e+00> : vector<8x128xf32>
    %6 = tpu.matmul %4, %5, %cst_6 {dimension_numbers = #tpu.dot_dimension_numbers<[1], [0], [0], [1], [0, 0, 1, 1], [], []>} : vector<8x128xf32>, vector<128x128xf32>, vector<8x128xf32> -> vector<8x128xf32>
    %c0_7 = arith.constant 0 : index
    %c0_8 = arith.constant 0 : index
    %7 = vector.load %arg4[%c0_7, %c0_8] : memref<1x128xf32, #tpu.memory_space<vmem>>, vector<1x128xf32>
    %8 = vector.broadcast %7 : vector<1x128xf32> to vector<8x128xf32>
    %9 = arith.addf %6, %8 : vector<8x128xf32>
    %10 = math.tanh %9 : vector<8x128xf32>
    %cst_9 = arith.constant 0.000000e+00 : f32
    %11 = vector.broadcast %cst_9 : f32 to vector<8x128xf32>
    %12 = arith.maximumf %10, %11 : vector<8x128xf32>
    %c0_10 = arith.constant 0 : index
    %c0_11 = arith.constant 0 : index
    %13 = vector.load %arg5[%c0_10, %c0_11] : memref<8x128xf32, #tpu.memory_space<vmem>>, vector<8x128xf32>
    tpu.vector_store %arg5[%c0_10, %c0_11], %12 {strides = array<i32>} : memref<8x128xf32, #tpu.memory_space<vmem>>, vector<8x128xf32>,
    return
  }
  func.func @transform_0(%arg0: i32) -> (i32, i32) {
    %c0_i32 = arith.constant 0 : i32
    %c0_i32_0 = arith.constant 0 : i32
    return %arg0, %c0_i32 : i32, i32
  }
  func.func @transform_1(%arg0: i32) -> (i32, i32) {
    %c0_i32 = arith.constant 0 : i32
    %c0_i32_0 = arith.constant 0 : i32
    %c0_i32_1 = arith.constant 0 : i32
    return %c0_i32, %c0_i32_0 : i32, i32
  }
  func.func @transform_2(%arg0: i32) -> (i32, i32) {
    %c0_i32 = arith.constant 0 : i32
    %c0_i32_0 = arith.constant 0 : i32
    %c0_i32_1 = arith.constant 0 : i32
    return %c0_i32, %c0_i32_0 : i32, i32
  }
  func.func @transform_3(%arg0: i32) -> (i32, i32) {
    %c0_i32 = arith.constant 0 : i32
    %c0_i32_0 = arith.constant 0 : i32
    %c0_i32_1 = arith.constant 0 : i32
    return %c0_i32, %c0_i32_0 : i32, i32
  }
  func.func @transform_4(%arg0: i32) -> (i32, i32) {
    %c0_i32 = arith.constant 0 : i32
    %c0_i32_0 = arith.constant 0 : i32
    return %arg0, %c0_i32 : i32, i32
  }
}

</mosaic_0001>

<bundles_post_ra>
// kernel: tpu_custom_call.1
= control target key start
LH: loop header
LB: loop body
LE: loop exit
PB: predicated region body
PF: predicated region fallthrough
CT: control target
= control target key end

     0   :  { %9 = vsyncpa [#allocation3], 0  ;;  %s312_s0 = inlined_call_operand.hbm [shape: f32[8,32], index: 0, kind: input, shape index: {}]   ;;  %s313_s1 = inlined_call_operand.hbm [shape: f32[32,128], index: 1, kind: input, shape index: {}]   ;;  %s314_s2 = inlined_call_operand.hbm [shape: f32[128,128], index: 2, kind: input, shape index: {}]   ;;  %s315_s3 = inlined_call_operand.vmem [shape: f32[1,128], index: 3, kind: input, shape index: {}]   ;;  %s316_s4 = inlined_call_operand.hbm [shape: f32[8,128], index: 4, kind: output, shape index: {}]  }
   0x1   :  { %10 = vsyncpa [#allocation6], 0  ;;  %s27_s17 = sshll.u32 %s313_s1, 4  ;;  %s28_s17 = int_to_ptr.hbm [resolvable:$true] %s27_s17 }
   0x2   :  { %11 = vsyncpa [#allocation4], 0  ;;  %s266_s18 = smov [#allocation5]   ;;  %s17_s22 = sshll.u32 %s312_s0, 4  ;;  %s18_s22 = int_to_ptr.hbm [resolvable:$true] %s17_s22 }
   0x3   :  { %s29_s19 = sshll.u32 %s266_s18, 4  ;;  %s267_s23 = smov 128   ;;  %s30_s19 = int_to_ptr.vmem [resolvable:$true] %s29_s19 }
   0x4   :  { %s268_s24 = smov 8   ;;  %s269_s25 = smov [#allocation2]  }
   0x5   :  { %35 = dma.hbm_to_vmem [thread:$0]  %s28_s17, 512, %s30_s19, [#allocation6], %s267_s23, %s267_s23, %s268_s24  }
   0x6   :  { %s19_s26 = sshll.u32 %s269_s25, 4  ;;  %s40_s29 = sshll.u32 %s314_s2, 4  ;;  %s20_s26 = int_to_ptr.vmem [resolvable:$true] %s19_s26  ;;  %s41_s29 = int_to_ptr.hbm [resolvable:$true] %s40_s29 }
   0x7   :  { %22 = dma.hbm_to_vmem [thread:$0]  %s18_s22, 128, %s20_s26, [#allocation3]  }
   0x8   :  { %s270_s1 = smov [#allocation7]  }
   0x9   :  { %s42_s30 = sshll.u32 %s270_s1, 4  ;;  %s43_s30 = int_to_ptr.vmem [resolvable:$true] %s42_s30 }
   0xa   :  { %48 = dma.hbm_to_vmem [thread:$0]  %s41_s29, 2048, %s43_s30, [#allocation6], %s267_s23, %s267_s23, %s268_s24  }
   0xb   :  { %260 = dma.done.wait [#allocation3], 128  }
   0xc   :  { %261 = vsyncadd [#allocation3], 4294967168 }
   0xd   :  { %262 = dma.done.wait [#allocation6], 2560  }
   0xe   :  { %263 = vsyncadd [#allocation6], 4294964736  ;;  %v67_v0 = vld [vmem:[#allocation5 + $0x18] sm:$0xff]  ;;  %v66_v1 = vld [vmem:[#allocation5 + $0x10] sm:$0xff]  ;;  %vm68_vm0 = vcmask 261120   ;;  %s271_s5 = smov [#allocation8]  }
   0xf   :  { %84 = vmatpush.msra.mxu0 %v67_v0  ;;  %v108_v2 = vld [vmem:[#allocation7 + $0x78] sm:$0xff]  ;;  %v65_v3 = vld [vmem:[#allocation5 + $0x8] sm:$0xff]  ;;  %v107_v4 = vld [vmem:[#allocation7 + $0x70] sm:$0xff]  ;;  %s141_s6 = sshll.u32 %s271_s5, 4  ;;  %s143_s9 = sshll.u32 %s316_s4, 4  ;;  %s142_s6 = int_to_ptr.vmem [resolvable:$true] %s141_s6  ;;  %s144_s9 = int_to_ptr.hbm [resolvable:$true] %s143_s9 }
  0x10   :  { %113 = vmatpush.msra.mxu1 %v108_v2  ;;  %v106_v5 = vld [vmem:[#allocation7 + $0x68] sm:$0xff]  ;;  %v64_v6 = vld [vmem:[#allocation5] sm:$0xff]  ;;  %v63_v7 = vld [vmem:[#allocation2] sm:$0xff] }
  0x11   :  { %85 = vmatpush.msra.mxu0 %v66_v1  ;;  %v105_v8 = vld [vmem:[#allocation7 + $0x60] sm:$0xff]  ;;  %v104_v9 = vld [vmem:[#allocation7 + $0x58] sm:$0xff]  ;;  %v103_v10 = vld [vmem:[#allocation7 + $0x50] sm:$0xff] }
  0x12   :  { %114 = vmatpush.msra.mxu1 %v107_v4  ;;  %v102_v11 = vld [vmem:[#allocation7 + $0x48] sm:$0xff]  ;;  %v101_v12 = vld [vmem:[#allocation7 + $0x40] sm:$0xff]  ;;  %v100_v13 = vld [vmem:[#allocation7 + $0x38] sm:$0xff] }
  0x13   :  { %86 = vmatpush.msra.mxu0 %v65_v3  ;;  %v99_v14 = vld [vmem:[#allocation7 + $0x30] sm:$0xff]  ;;  %v98_v15 = vld [vmem:[#allocation7 + $0x28] sm:$0xff]  ;;  %v97_v16 = vld [vmem:[#allocation7 + $0x20] sm:$0xff] }
  0x14   :  { %115 = vmatpush.msra.mxu1 %v106_v5  ;;  %v96_v17 = vld [vmem:[#allocation7 + $0x18] sm:$0xff]  ;;  %v95_v18 = vld [vmem:[#allocation7 + $0x10] sm:$0xff]  ;;  %v94_v19 = vld [vmem:[#allocation7 + $0x8] sm:$0xff] }
  0x15   :  { %87 = vmatpush.msra.mxu0 %v64_v6  ;;  %v93_v20 = vld [vmem:[#allocation7] sm:$0xff]  ;;  %v161_v23 = vld [vmem:[%s315_s3] ss:$0 sm:$0xff] }
  0x16   :  { %154 = vmatmul.msk.f32.vlgmr.msra.gmra.mxu0 %vm68_vm0, %v63_v7  ;;  %116 = vmatpush.msra.mxu1 %v105_v8 }
  0x18   :  { %117 = vmatpush.msra.mxu1 %v104_v9 }
  0x1a   :  { %118 = vmatpush.msra.mxu1 %v103_v10 }
  0x1c   :  { %119 = vmatpush.msra.mxu1 %v102_v11 }
  0x1e   :  { %120 = vmatpush.msra.mxu1 %v101_v12 }
  0x20   :  { %121 = vmatpush.msra.mxu1 %v100_v13 }
  0x22   :  { %122 = vmatpush.msra.mxu1 %v99_v14 }
  0x24   :  { %123 = vmatpush.msra.mxu1 %v98_v15 }
  0x26   :  { %124 = vmatpush.msra.mxu1 %v97_v16 }
  0x28   :  { %125 = vmatpush.msra.mxu1 %v96_v17 }
  0x2a   :  { %126 = vmatpush.msra.mxu1 %v95_v18 }
  0x2c   :  { %127 = vmatpush.msra.mxu1 %v94_v19 }
  0x2e   :  { %128 = vmatpush.msra.mxu1 %v93_v20 }
  0x93   :  { %v89_v21 = vpop.f32.mrf.mxu0 }
  0x94   :  { %v92_v22 = vmax.f32 %v89_v21, 0.0 }
  0x96   :  { %129 = vmatmul.f32.vlgmr.msra.gmra.mxu1 %v92_v22 }
 0x113   :  { %v130_v24 = vpop.f32.mrf.mxu1 }
 0x114   :  { %v131_v25 = vadd.f32 %v161_v23, %v130_v24 }
 0x116   :  { %162 = vtanh.f32 %v131_v25 }
 0x11c   :  { %v163_v26 = vpop.eup %162 }
 0x11d   :  { %v134_v27 = vmax.f32 %v163_v26, 0.0 }
 0x11f   :  { %135 = vst [vmem:[#allocation8] sm:$0xff] %v134_v27 }
 0x120   :  { %146 = dma.vmem_to_hbm [thread:$0]  %s142_s6, 128, %s144_s9, [#allocation4]  }
 0x121   :  { %264 = dma.done.wait [#allocation4], 128  }
 0x122   :  { %265 = vsyncadd [#allocation4], 4294967168 }
 0x123   :  { %151 = vsyncpa [#allocation3], 1 }
 0x124   :  { %152 = vsyncpa [#allocation6], 1 }
 0x125   :  { %153 = vsyncpa [#allocation4], 1 }

</bundles_post_ra>
